<compile_context>
chip_gen: v5e
topology: v5e:2x2
jax: 0.10.0
libtpu: 0.0.40
codegen_flags: <defaults>
</compile_context>

<pallas_src>
import functools

import jax
import jax.numpy as jnp
from jax.experimental import pallas as pl
from jax.experimental.pallas import tpu as pltpu


def _round_up(x, m):
    return ((x + m - 1) // m) * m


def _focal_kernel(w_ref, x_ref, t_ref, fce_ref, *, gamma, n_classes):
    """One (1, C, TL) logits tile + (1, 1, TL) targets -> (1, 1, TL) focal*ce.

    Pixels are on the lane axis; the class reduction is an unrolled loop over
    the C sublanes (elementwise max / exp / select), so no cross-lane work and
    full lane utilization.  Padded pixels carry target == -1, which matches no
    class -> zero weight -> exactly zero loss contribution.
    """
    x = x_ref[0].astype(jnp.float32)          # (C, TL) logits (f32 in-register)
    t = t_ref[0]                              # (1, TL) int32 class ids

    # max over classes (numerical stability)
    m = x[0:1, :]
    for c in range(1, n_classes):
        m = jnp.maximum(m, x[c:c + 1, :])

    # sum(exp(x - m)), target logit and per-pixel class weight in one pass
    s = jnp.zeros_like(m)
    x_t = jnp.zeros_like(m)
    w_t = jnp.zeros_like(m)
    for c in range(n_classes):
        xc = x[c:c + 1, :]
        s = s + jnp.exp(xc - m)
        hit = t == c
        x_t = jnp.where(hit, xc, x_t)
        w_t = jnp.where(hit, w_ref[c], w_t)   # scalar SMEM read, lane-broadcast

    ce = (m - x_t) + jnp.log(s)               # per-pixel cross entropy
    pt = jnp.exp(-ce)
    d = 1.0 - pt
    if gamma == 2.0:
        mod = d * d                           # fast path: one VPU mul, no pow
    else:
        mod = jnp.power(jnp.maximum(d, 0.0), gamma)
    fce_ref[0] = w_t * mod * ce               # (1, TL) lane-dense store


def softmax_focal_loss(logits, target, *, gamma=2.0, weight=None,
                       reduction="mean", tl=2048):
    """logits: (N, C, H, W); target: (N, H, W) int class indices."""
    assert reduction in ("sum", "mean", "none")
    N, C, H, W = logits.shape
    L = H * W

    # Free views only: keep NCHW, put pixels (H*W) on the last (lane) axis.
    # Do NOT upcast logits here; the kernel casts tiles to f32 in-register.
    x = logits.reshape(N, C, L)
    t = target.reshape(N, 1, L).astype(jnp.int32)

    if weight is None:
        wvec = jnp.ones((C,), jnp.float32)
    else:
        wvec = jnp.asarray(weight, jnp.float32).reshape(C)

    # Lane tile: big (default 2048 pixels) to amortize per-step overhead,
    # multiple of 128 for dense vregs / unmasked stores.
    tile = min(int(tl), _round_up(L, 128))
    tile = _round_up(tile, 128)
    l_pad = _round_up(L, tile)
    if l_pad != L:
        x = jnp.pad(x, ((0, 0), (0, 0), (0, l_pad - L)))
        t = jnp.pad(t, ((0, 0), (0, 0), (0, l_pad - L)), constant_values=-1)

    grid = (N, l_pad // tile)
    kernel = functools.partial(_focal_kernel, gamma=float(gamma), n_classes=C)

    fce = pl.pallas_call(
        kernel,
        out_shape=jax.ShapeDtypeStruct((N, 1, l_pad), jnp.float32),
        grid_spec=pltpu.PrefetchScalarGridSpec(
            num_scalar_prefetch=0,
            grid=grid,
            in_specs=[
                # per-class weights: whole small vector resident in SMEM
                pl.BlockSpec(memory_space=pltpu.MemorySpace.SMEM),
                # logits: (1, C, TL) blocks, pixels lane-dense
                pl.BlockSpec((1, C, tile), lambda n, i: (n, 0, i)),
                # targets: (1, 1, TL) blocks, lane-dense int32
                pl.BlockSpec((1, 1, tile), lambda n, i: (n, 0, i)),
            ],
            out_specs=pl.BlockSpec((1, 1, tile), lambda n, i: (n, 0, i)),
        ),
        compiler_params=pltpu.CompilerParams(
            dimension_semantics=("parallel", "parallel")),
    )(wvec, x, t)

    if reduction == "none":
        # flattened (N*H*W,) per-element loss, same order as PyTorch .view(-1)
        return fce[:, 0, :L].reshape(-1)

    total = jnp.sum(fce)                     # padded pixels contribute exact 0
    if reduction == "sum":
        return total

    # 'mean': divide by the sum of per-pixel class weights (count if unweighted)
    if weight is None:
        denom = jnp.float32(N * L)
    else:
        denom = jnp.sum(jnp.take(wvec, target.reshape(-1)))
    return total / denom


def _reference(logits, target, gamma=2.0, weight=None, reduction="mean"):
    """Pure-JAX reference mirroring the PyTorch module."""
    N, C, H, W = logits.shape
    x = jnp.transpose(logits, (0, 2, 3, 1)).reshape(-1, C).astype(jnp.float32)
    t = target.reshape(-1)
    lse = jax.nn.logsumexp(x, axis=-1)
    ce = lse - jnp.take_along_axis(x, t[:, None], axis=1)[:, 0]
    pt = jnp.exp(-ce)
    if weight is None:
        w = jnp.ones_like(ce)
    else:
        w = jnp.asarray(weight, jnp.float32)[t]
    focal = w * (1.0 - pt) ** gamma
    if reduction == "mean":
        return jnp.sum(focal * ce) / jnp.sum(w)
    elif reduction == "sum":
        return jnp.sum(focal * ce)
    return focal * ce


if __name__ == "__main__":
    key = jax.random.PRNGKey(0)
    k1, k2, k3, k4 = jax.random.split(key, 4)

    N, C, H, W = 2, 4, 16, 16
    logits = jax.random.normal(k1, (N, C, H, W), dtype=jnp.float32)
    target = jax.random.randint(k2, (N, H, W), 0, C, dtype=jnp.int32)
    class_weight = jnp.array([1.0, 0.5, 2.0, 1.5], dtype=jnp.float32)

    # default module config: gamma=2.0, weight=None, reduction='mean'
    out_mean = jax.block_until_ready(
        softmax_focal_loss(logits, target, gamma=2.0, weight=None,
                           reduction="mean"))
    ref_mean = _reference(logits, target, gamma=2.0, weight=None,
                          reduction="mean")
    assert jnp.allclose(out_mean, ref_mean, rtol=1e-5, atol=1e-5)

    # weighted + sum reduction
    out_sum = jax.block_until_ready(
        softmax_focal_loss(logits, target, gamma=2.0, weight=class_weight,
                           reduction="sum"))
    ref_sum = _reference(logits, target, gamma=2.0, weight=class_weight,
                         reduction="sum")
    assert jnp.allclose(out_sum, ref_sum, rtol=1e-5, atol=1e-5)

    # 'none' reduction (per-element loss, flattened)
    out_none = jax.block_until_ready(
        softmax_focal_loss(logits, target, gamma=2.0, weight=class_weight,
                           reduction="none"))
    ref_none = _reference(logits, target, gamma=2.0, weight=class_weight,
                          reduction="none")
    assert jnp.allclose(out_none, ref_none, rtol=1e-5, atol=1e-5)

    # non-multiple-of-128 pixel count (exercises lane padding) + general gamma
    H2, W2 = 10, 13
    logits2 = jax.random.normal(k3, (N, C, H2, W2), dtype=jnp.float32)
    target2 = jax.random.randint(k4, (N, H2, W2), 0, C, dtype=jnp.int32)
    out2 = jax.block_until_ready(
        softmax_focal_loss(logits2, target2, gamma=1.5, weight=class_weight,
                           reduction="mean"))
    ref2 = _reference(logits2, target2, gamma=1.5, weight=class_weight,
                      reduction="mean")
    assert jnp.allclose(out2, ref2, rtol=1e-5, atol=1e-5)

    # multi-tile pixel grid (small tile override) reproduces the same mean
    out3 = jax.block_until_ready(
        softmax_focal_loss(logits, target, gamma=2.0, weight=None,
                           reduction="mean", tl=128))
    assert jnp.allclose(out3, ref_mean, rtol=1e-5, atol=1e-5)

    print("KERNEL_OK")
</pallas_src>

<mosaic_0001>
module attributes {stable_mosaic.version = 11 : i64} {
  func.func @_focal_kernel(%arg0: i32, %arg1: i32, %arg2: memref<4xf32, #tpu.memory_space<smem>>, %arg3: memref<1x4x256xf32, #tpu.memory_space<vmem>>, %arg4: memref<1x1x256xi32, #tpu.memory_space<vmem>>, %arg5: memref<1x1x256xf32, #tpu.memory_space<vmem>>) attributes {dimension_semantics = [#tpu.dimension_semantics<parallel>, #tpu.dimension_semantics<parallel>], iteration_bounds = array<i64: 2, 1>, scalar_prefetch = 0 : i64, scratch_operands = 0 : i64, tpu.core_type = #tpu.core_type<tc>, window_params = [{transform_indices = @transform_0, window_bounds = array<i64: 4>}, {transform_indices = @transform_1, window_bounds = array<i64: 1, 4, 256>}, {transform_indices = @transform_2, window_bounds = array<i64: 1, 1, 256>}, {transform_indices = @transform_3, window_bounds = array<i64: 1, 1, 256>}]} {
    %c0 = arith.constant 0 : index
    %c0_0 = arith.constant 0 : index
    %c0_1 = arith.constant 0 : index
    %0 = vector.load %arg3[%c0, %c0_0, %c0_1] : memref<1x4x256xf32, #tpu.memory_space<vmem>>, vector<1x4x256xf32>
    %1 = vector.shape_cast %0 : vector<1x4x256xf32> to vector<4x256xf32>
    %c0_2 = arith.constant 0 : index
    %c0_3 = arith.constant 0 : index
    %c0_4 = arith.constant 0 : index
    %2 = vector.load %arg4[%c0_2, %c0_3, %c0_4] : memref<1x1x256xi32, #tpu.memory_space<vmem>>, vector<1x1x256xi32>
    %3 = vector.shape_cast %2 : vector<1x1x256xi32> to vector<1x256xi32>
    %4 = vector.extract_strided_slice %1 {offsets = [0, 0], sizes = [1, 256], strides = [1, 1]} : vector<4x256xf32> to vector<1x256xf32>
    %5 = vector.extract_strided_slice %1 {offsets = [1, 0], sizes = [1, 256], strides = [1, 1]} : vector<4x256xf32> to vector<1x256xf32>
    %6 = arith.maximumf %4, %5 : vector<1x256xf32>
    %7 = vector.extract_strided_slice %1 {offsets = [2, 0], sizes = [1, 256], strides = [1, 1]} : vector<4x256xf32> to vector<1x256xf32>
    %8 = arith.maximumf %6, %7 : vector<1x256xf32>
    %9 = vector.extract_strided_slice %1 {offsets = [3, 0], sizes = [1, 256], strides = [1, 1]} : vector<4x256xf32> to vector<1x256xf32>
    %10 = arith.maximumf %8, %9 : vector<1x256xf32>
    %cst = arith.constant 0.000000e+00 : f32
    %11 = vector.broadcast %cst : f32 to vector<1x256xf32>
    %cst_5 = arith.constant 0.000000e+00 : f32
    %12 = vector.broadcast %cst_5 : f32 to vector<1x256xf32>
    %cst_6 = arith.constant 0.000000e+00 : f32
    %13 = vector.broadcast %cst_6 : f32 to vector<1x256xf32>
    %14 = vector.extract_strided_slice %1 {offsets = [0, 0], sizes = [1, 256], strides = [1, 1]} : vector<4x256xf32> to vector<1x256xf32>
    %15 = arith.subf %14, %10 : vector<1x256xf32>
    %16 = math.exp %15 : vector<1x256xf32>
    %17 = arith.addf %11, %16 : vector<1x256xf32>
    %c0_i32 = arith.constant 0 : i32
    %18 = vector.broadcast %c0_i32 : i32 to vector<1x256xi32>
    %19 = arith.cmpi eq, %3, %18 : vector<1x256xi32>
    %20 = arith.select %19, %14, %12 : vector<1x256xi1>, vector<1x256xf32>
    %c0_7 = arith.constant 0 : index
    %21 = memref.load %arg2[%c0_7] : memref<4xf32, #tpu.memory_space<smem>>
    %22 = vector.broadcast %21 : f32 to vector<1x256xf32>
    %23 = arith.select %19, %22, %13 : vector<1x256xi1>, vector<1x256xf32>
    %24 = vector.extract_strided_slice %1 {offsets = [1, 0], sizes = [1, 256], strides = [1, 1]} : vector<4x256xf32> to vector<1x256xf32>
    %25 = arith.subf %24, %10 : vector<1x256xf32>
    %26 = math.exp %25 : vector<1x256xf32>
    %27 = arith.addf %17, %26 : vector<1x256xf32>
    %c1_i32 = arith.constant 1 : i32
    %28 = vector.broadcast %c1_i32 : i32 to vector<1x256xi32>
    %29 = arith.cmpi eq, %3, %28 : vector<1x256xi32>
    %30 = arith.select %29, %24, %20 : vector<1x256xi1>, vector<1x256xf32>
    %c1 = arith.constant 1 : index
    %31 = memref.load %arg2[%c1] : memref<4xf32, #tpu.memory_space<smem>>
    %32 = vector.broadcast %31 : f32 to vector<1x256xf32>
    %33 = arith.select %29, %32, %23 : vector<1x256xi1>, vector<1x256xf32>
    %34 = vector.extract_strided_slice %1 {offsets = [2, 0], sizes = [1, 256], strides = [1, 1]} : vector<4x256xf32> to vector<1x256xf32>
    %35 = arith.subf %34, %10 : vector<1x256xf32>
    %36 = math.exp %35 : vector<1x256xf32>
    %37 = arith.addf %27, %36 : vector<1x256xf32>
    %c2_i32 = arith.constant 2 : i32
    %38 = vector.broadcast %c2_i32 : i32 to vector<1x256xi32>
    %39 = arith.cmpi eq, %3, %38 : vector<1x256xi32>
    %40 = arith.select %39, %34, %30 : vector<1x256xi1>, vector<1x256xf32>
    %c2 = arith.constant 2 : index
    %41 = memref.load %arg2[%c2] : memref<4xf32, #tpu.memory_space<smem>>
    %42 = vector.broadcast %41 : f32 to vector<1x256xf32>
    %43 = arith.select %39, %42, %33 : vector<1x256xi1>, vector<1x256xf32>
    %44 = vector.extract_strided_slice %1 {offsets = [3, 0], sizes = [1, 256], strides = [1, 1]} : vector<4x256xf32> to vector<1x256xf32>
    %45 = arith.subf %44, %10 : vector<1x256xf32>
    %46 = math.exp %45 : vector<1x256xf32>
    %47 = arith.addf %37, %46 : vector<1x256xf32>
    %c3_i32 = arith.constant 3 : i32
    %48 = vector.broadcast %c3_i32 : i32 to vector<1x256xi32>
    %49 = arith.cmpi eq, %3, %48 : vector<1x256xi32>
    %50 = arith.select %49, %44, %40 : vector<1x256xi1>, vector<1x256xf32>
    %c3 = arith.constant 3 : index
    %51 = memref.load %arg2[%c3] : memref<4xf32, #tpu.memory_space<smem>>
    %52 = vector.broadcast %51 : f32 to vector<1x256xf32>
    %53 = arith.select %49, %52, %43 : vector<1x256xi1>, vector<1x256xf32>
    %54 = arith.subf %10, %50 : vector<1x256xf32>
    %55 = math.log %47 : vector<1x256xf32>
    %56 = arith.addf %54, %55 : vector<1x256xf32>
    %cst_8 = arith.constant 0.000000e+00 : f32
    %57 = vector.broadcast %cst_8 : f32 to vector<1x256xf32>
    %58 = arith.subf %57, %56 : vector<1x256xf32>
    %59 = math.exp %58 : vector<1x256xf32>
    %cst_9 = arith.constant 1.000000e+00 : f32
    %60 = vector.broadcast %cst_9 : f32 to vector<1x256xf32>
    %61 = arith.subf %60, %59 : vector<1x256xf32>
    %62 = arith.mulf %61, %61 : vector<1x256xf32>
    %63 = arith.mulf %53, %62 : vector<1x256xf32>
    %64 = arith.mulf %63, %56 : vector<1x256xf32>
    %c0_10 = arith.constant 0 : index
    %c0_11 = arith.constant 0 : index
    %c0_12 = arith.constant 0 : index
    %65 = vector.load %arg5[%c0_10, %c0_11, %c0_12] : memref<1x1x256xf32, #tpu.memory_space<vmem>>, vector<1x1x256xf32>
    %66 = vector.shape_cast %65 : vector<1x1x256xf32> to vector<1x256xf32>
    %67 = vector.shape_cast %64 : vector<1x256xf32> to vector<1x1x256xf32>
    tpu.vector_store %arg5[%c0_10, %c0_11, %c0_12], %67 {strides = array<i32>} : memref<1x1x256xf32, #tpu.memory_space<vmem>>, vector<1x1x256xf32>,
    return
  }
  func.func @transform_0(%arg0: i32, %arg1: i32) -> i32 {
    %c0_i32 = arith.constant 0 : i32
    %c0_i32_0 = arith.constant 0 : i32
    return %c0_i32 : i32
  }
  func.func @transform_1(%arg0: i32, %arg1: i32) -> (i32, i32, i32) {
    %c0_i32 = arith.constant 0 : i32
    %c0_i32_0 = arith.constant 0 : i32
    return %arg0, %c0_i32, %arg1 : i32, i32, i32
  }
  func.func @transform_2(%arg0: i32, %arg1: i32) -> (i32, i32, i32) {
    %c0_i32 = arith.constant 0 : i32
    %c0_i32_0 = arith.constant 0 : i32
    return %arg0, %c0_i32, %arg1 : i32, i32, i32
  }
  func.func @transform_3(%arg0: i32, %arg1: i32) -> (i32, i32, i32) {
    %c0_i32 = arith.constant 0 : i32
    %c0_i32_0 = arith.constant 0 : i32
    return %arg0, %c0_i32, %arg1 : i32, i32, i32
  }
}

</mosaic_0001>

<bundles_post_ra>
// kernel: tpu_custom_call.1
= control target key start
LH: loop header
LB: loop body
LE: loop exit
PB: predicated region body
PF: predicated region fallthrough
CT: control target
= control target key end

     0   :  { %s1003_s0 = inlined_call_operand.hbm [shape: f32[4], index: 0, kind: input, shape index: {}]   ;;  %s1004_s1 = inlined_call_operand.hbm [shape: f32[2,4,256], index: 1, kind: input, shape index: {}]   ;;  %s1005_s2 = inlined_call_operand.hbm [shape: s32[2,1,256], index: 2, kind: input, shape index: {}]   ;;  %s1006_s3 = inlined_call_operand.hbm [shape: f32[2,1,256], index: 3, kind: output, shape index: {}]  }
   0x1   :  { %1008 = sst [smem:[#allocation16_spill]] %s1003_s0 }
   0x2   :  { %8 = vsyncpa [#allocation5], 0 }
   0x3   :  { %9 = vsyncpa [#allocation3], 0 }
   0x4   :  { %11 = vsyncpa [#allocation3 + $0x1], 0 }
   0x5   :  { %12 = vsyncpa [#allocation8], 0 }
   0x6   :  { %14 = vsyncpa [#allocation8 + $0x1], 0 }
   0x7   :  { %15 = vsyncpa [#allocation4], 0 }
   0x8   :  { %17 = vsyncpa [#allocation4 + $0x1], 0  ;;  %s830_s12 = smov 0   ;;  %s832_s13 = smov 0  }
   0x9   :  { %s834_s14 = smov 0   ;;  %s836_s15 = smov 0  }
   0xa   :  { %s838_s16 = smov 0   ;;  %s840_s17 = smov 0  }
   0xb LB: > { %s521_s18 = sadd.s32 4294967295, %s806_s17   ;;  %s522_s19 = sadd.s32 4294967294, %s806_s17   ;;  %s806_s17 = sphi %s840_s17, %s23_s17   ;;  %s802_s16 = sphi %s838_s16, %s1025_s16   ;;  %s798_s15 = sphi %s836_s15, %s1024_s15   ;;  %s794_s14 = sphi %s834_s14, %s1023_s14   ;;  %s790_s13 = sphi %s832_s13, %s1022_s13   ;;  %s786_s12 = sphi %s830_s12, %s1021_s12  }
   0xc   : > { %p78_p0 = scmp.ne.s32.totalorder %s790_s13, %s786_s12  ;;  %p864_p1 = scmp.eq.s32.totalorder %s521_s18, 0 }
   0xd   : > { %p868_p2 = scmp.eq.s32.totalorder %s521_s18, 1  ;;  %p138_p3 = scmp.eq.s32.totalorder %s522_s19, 1 }
   0xe   : > { %p874_p4 = por %p864_p1, %p78_p0  ;;  %p523_p5 = scmp.ge.s32.totalorder %s806_s17, 1 }
   0xf   : > { %p879_p6 = por %p138_p3, %p78_p0  ;;  %p145_p7 = scmp.lt.s32.totalorder %s806_s17, 3 }
  0x10   : > { %s1013_s0 = sld [smem:[#allocation16_spill]]  ;;  %s35_s28 = sadd.s32 1, %s802_s16 }
  0x11   : > { %p887_p8 = pnand %p523_p5, %p145_p7  ;;  %s65_s29 = sadd.s32 1, %s794_s14 }
  0x12   : > { %p37_p12 = scmp.ge.s32.totalorder %s35_s28, 2  ;;  %s808_s30 = smov [#allocation2]  }
  0x13   : > { %p560_p10 = pneg %p887_p8  ;;  %p72_p13 = scmp.ne.s32.totalorder %s794_s14, %s790_s13 }
  0x14   : > { %s1027_s28 = smov (%p37_p12, %s35_s28), 0  ;;  %p73_p0 = scmp.eq.s32.totalorder %s806_s17, 0 }
  0x15   : > { %p561_p11 = pnand %p560_p10, %p864_p1  ;;  %1015 = sst [smem:[#allocation14_spill]] %s1027_s28 }
  0x16   : > { %s157_s26 = sshll.u32 %s1013_s0, 4  ;;  %s60_s4 = ssub.s32 %s802_s16, %s1027_s28  ;;  %s158_s26 = int_to_ptr.hbm [resolvable:$true] %s157_s26 }
  0x17   : > { %563 = dma.hbm_to_smem (!%p561_p11), %s158_s26, 16, %s808_s30, [#allocation5]  }
  0x18   : > { %p576_p3 = scmp.lt.s32.totalorder %s806_s17, 2  ;;  %p63_p5 = scmp.eq.s32.totalorder %s60_s4, 0 }
  0x19   : > { %p74_p7 = por %p73_p0, %p72_p13  ;;  %p908_p9 = por %p868_p2, %p72_p13 }
  0x1a   : > { %s168_s6 = sand.u32 1, %s794_s14   ;;  %s549_s9 = sshll.u32 %s802_s16, 3 }
  0x1b   : > { %s914_s7 = scalar_select %p63_p5, %s794_s14, %s65_s29  }
  0x1c   : > { %s526_s8 = sshll.u32 %s168_s6, 3  ;;  %s179_s18 = scalar_lea.hbm %s1004_s1, %s549_s9 }
  0x1d   : > { %1017 = sst [smem:[#allocation15_spill]] %s914_s7  ;;  %s172_s19 = scalar_lea.vmem [#allocation6], %s526_s8 }
  0x1e   : > { %s183_s24 = sshll.u32 %s172_s19, 4  ;;  %s181_s25 = sshll.u32 %s179_s18, 4  ;;  %s184_s24 = int_to_ptr.vmem [resolvable:$true] %s183_s24  ;;  %s182_s25 = int_to_ptr.hbm [resolvable:$true] %s181_s25 }
  0x1f   : > { %p565_p10 = pnand %p576_p3, %p74_p7  ;;  %s529_s21 = sshll.u32 %s168_s6, 1 }
  0x20   : > { %s169_s26 = scalar_lea.sflag [#allocation3], %s168_s6  ;;  %s530_s30 = sshll.u32 %s802_s16, 1 }
  0x21   : > { %567 = dma.hbm_to_vmem [thread:$0]  (!%p565_p10), %s182_s25, 128, %s184_s24, %s169_s26  }
  0x22   : > { %s194_s4 = scalar_lea.vmem [#allocation7], %s529_s21  ;;  %s200_s7 = scalar_lea.hbm %s1005_s2, %s530_s30 }
  0x23   : > { %s204_s29 = sshll.u32 %s194_s4, 4  ;;  %s202_s10 = sshll.u32 %s200_s7, 4  ;;  %s205_s29 = int_to_ptr.vmem [resolvable:$true] %s204_s29  ;;  %s203_s10 = int_to_ptr.hbm [resolvable:$true] %s202_s10 }
  0x24   : > { %s191_s8 = scalar_lea.sflag [#allocation8], %s168_s6  ;;  %213 = sbr.rel (%p887_p8) target bundleno = 117 (0x75), region = 32 }
  0x25   : > { %570 = dma.hbm_to_vmem [thread:$0]  (!%p565_p10), %s203_s10, 32, %s205_s29, %s191_s8  }
  0x29   : > { %769 = dma.done.wait (%p864_p1), [#allocation5], 16  }
  0x2a   : > { %771 = vsyncadd (%p864_p1), [#allocation5], 4294967280  ;;  %s933_s9 = sand.u32 1, %s790_s13  }
  0x2b   : > { %s533_s0 = sshll.u32 %s933_s9, 3  ;;  %s221_s28 = scalar_lea.sflag [#allocation3], %s933_s9 }
  0x2c   : > { %s224_s7 = scalar_lea.vmem [#allocation6], %s533_s0 }
  0x2d   : > { %773 = dma.done.wait (%p874_p4), %s221_s28, 128  }
  0x2e   : > { %775 = vsyncadd (%p874_p4), %s221_s28, 4294967168  ;;  %s534_s20 = sshll.u32 %s933_s9, 1  ;;  %s231_s27 = scalar_lea.sflag [#allocation8], %s933_s9 }
  0x2f   : > { %s945_s6 = scalar_lea.vmem [#allocation7], %s534_s20 }
  0x30   : > { %777 = dma.done.wait (%p874_p4), %s231_s27, 32  }
  0x31   : > { %779 = vsyncadd (%p874_p4), %s231_s27, 4294967264 }
  0x32   : > { %240 = sfence }
  0x33   : > { %v267_v0 = vld [vmem:[%s224_s7] sm:$0xff]  ;;  %v268_v21 = vld [vmem:[%s945_s6] sm:$0x3]  ;;  %vm288_vm0 = vcmask 1040384   ;;  %v809_v32 = vmov 286326784   ;;  %s292_s22 = sld [smem:[#allocation2]]  ;;  %v378_v61 = vlaneseq }
  0x34   : > { %307 = vst [vmem:[#allocation1] sm:$0xff] %v267_v0  ;;  %v536_v1 = vrot.slane %v267_v0, 9  ;;  %v537_v2 = vrot.slane %v267_v0, 10  ;;  %v538_v4 = vrot.slane %v267_v0, 11  ;;  %v287_v20 = vrot.slane %v267_v0, 3  ;;  %s540_s11 = sld [smem:[#allocation2 + $0x1]] }
  0x35   : > { %vm286_vm1 = vcmp.eq.s32.totalorder %v268_v21, 0  ;;  %vm306_vm2 = vcmp.eq.s32.totalorder %v268_v21, 1  ;;  %v355_v33 = vunpack.c.l.s4 %v809_v32  ;;  %vm325_vm3 = vcmp.eq.s32.totalorder %v268_v21, 2  ;;  %s542_s18 = sld [smem:[#allocation2 + $0x2]]  ;;  %s546_s24 = sshll.u32 %s798_s15, 1 }
  0x36   : > { %v273_v3 = vmax.f32 %v267_v0, %v536_v1  ;;  %v289_v23 = vsel %vm288_vm0, %v267_v0, %v287_v20  ;;  %vm344_vm4 = vcmp.eq.s32.totalorder %v268_v21, 3  ;;  %s544_s19 = sld [smem:[#allocation2 + $0x3]]  ;;  %s396_s26 = scalar_lea.hbm %s1006_s3, %s546_s24  ;;  %vm380_vm5 = vcmp.lt.s32.totalorder %v378_v61, 256 }
  0x37   : > { %v291_v28 = vsel %vm286_vm1, %v289_v23, 0.0  ;;  %v356_v39 = vunpack.c.0.s8 %v355_v33  ;;  %s263_s30 = scalar_lea.vmem [#allocation9], %s534_s20  ;;  %s400_s4 = sshll.u32 %s396_s26, 4  ;;  %s401_s4 = int_to_ptr.hbm [resolvable:$true] %s400_s4 }
  0x38   : > { %v277_v5 = vmax.f32 %v273_v3, %v537_v2  ;;  %s398_s15 = sshll.u32 %s263_s30, 4  ;;  %s384_s29 = scalar_lea.sflag [#allocation4], %s933_s9  ;;  %s399_s15 = int_to_ptr.vmem [resolvable:$true] %s398_s15 }
  0x39   : > { %v293_v48 = vstv %s292_s22  ;;  %s730_s10 = sshra.s32 %s401_s4, 4  ;;  %s736_s7 = scalar_lea.hbm %s1006_s3, 4  ;;  %s731_s10 = int_to_ptr.hbm [resolvable:$true] %s730_s10 }
  0x3a   : > { %v281_v7 = vmax.f32 %v277_v5, %v538_v4  ;;  %v294_v49 = vsel %vm286_vm1, %v293_v48, 0.0  ;;  %v313_v50 = vstv %s540_s11  ;;  %s732_s8 = scalar_lea.hbm %s731_s10, 2  ;;  %p737_p8 = scmp.lt.s32.totalorder %s731_s10, %s1006_s3 }
  0x3b   : > { %v309_v6 = vld [vmem:[#allocation1 + $0x1] ss:$4 sm:$0xff]  ;;  %v314_v51 = vsel %vm306_vm2, %v313_v50, %v294_v49  ;;  %v332_v52 = vstv %s542_s18  ;;  %p733_p1 = scmp.ne.s32.totalorder %s731_s10, %s732_s8  ;;  %p738_p11 = scmp.lt.s32.totalorder %s736_s7, %s732_s8 }
  0x3c   : > { %326 = vst [vmem:[#allocation1] sm:$0xff] %v267_v0  ;;  %v282_v8 = vsub.f32 %v267_v0, %v281_v7  ;;  %v296_v9 = vrot.slane %v281_v7, 7  ;;  %v315_v10 = vrot.slane %v281_v7, 6  ;;  %v334_v11 = vrot.slane %v281_v7, 5 }
  0x3d   : > { %v311_v34 = vsel %vm306_vm2, %v309_v6, %v291_v28  ;;  %v333_v55 = vsel %vm325_vm3, %v332_v52, %v314_v51  ;;  %v351_v56 = vstv %s544_s19  ;;  %p734_p2 = pnand %p733_p1, %p908_p9  ;;  %p739_p12 = por %p738_p11, %p737_p8 }
  0x3e   : > { %v283_v12 = vmul.f32 1.442695, %v282_v8  ;;  %v298_v13 = vsub.f32 %v267_v0, %v296_v9  ;;  %v317_v14 = vsub.f32 %v267_v0, %v315_v10  ;;  %v336_v15 = vsub.f32 %v267_v0, %v334_v11 }
  0x3f   : > { %v352_v58 = vsel %vm344_vm4, %v351_v56, %v333_v55  ;;  %p735_p4 = pneg %p734_p2 }
  0x40   : > { %v299_v16 = vmul.f32 1.442695, %v298_v13  ;;  %v318_v17 = vmul.f32 1.442695, %v317_v14  ;;  %629 = vpow2.f32 %v283_v12  ;;  %v337_v18 = vmul.f32 1.442695, %v336_v15 }
  0x41   : > { %p740_p13 = pnand %p739_p12, %p735_p4 }
  0x42   : > { %631 = vpow2.f32 %v299_v16 }
  0x43   : > { %v328_v19 = vld [vmem:[#allocation1 + $0x2] ss:$4 sm:$0xff]  ;;  %633 = vpow2.f32 %v318_v17 }
  0x44   : > { %345 = vst [vmem:[#allocation1] sm:$0xff] %v267_v0  ;;  %635 = vpow2.f32 %v337_v18  ;;  %v330_v38 = vsel %vm325_vm3, %v328_v19, %v311_v34 }
  0x46   : > { %v630_v22 = vpop.eup %629 }
  0x48   : > { %v632_v24 = vpop.eup %631 }
  0x49   : > { %v634_v25 = vpop.eup %633  ;;  %v539_v26 = vrot.slane %v632_v24, 9 }
  0x4a   : > { %v636_v27 = vpop.eup %635  ;;  %v541_v29 = vrot.slane %v634_v25, 10 }
  0x4b   : > { %v305_v30 = vadd.f32 %v630_v22, %v539_v26  ;;  %v543_v31 = vrot.slane %v636_v27, 11  ;;  %v347_v36 = vld [vmem:[#allocation1 + $0x3] ss:$4 sm:$0xff] }
  0x4c   : > { %v349_v40 = vsel %vm344_vm4, %v347_v36, %v330_v38 }
  0x4d   : > { %v324_v35 = vadd.f32 %v541_v29, %v305_v30  ;;  %v357_v41 = vperm.slane %v349_v40, %v356_v39 }
  0x4f   : > { %v343_v37 = vadd.f32 %v543_v31, %v324_v35  ;;  %v359_v43 = vsub.f32 %v281_v7, %v357_v41 }
  0x51   : > { %637 = vlog2.f32 %v343_v37 }
  0x57   : > { %v638_v42 = vpop.eup %637 }
  0x58   : > { %v361_v44 = vmul.f32 0.6931472, %v638_v42 }
  0x5a   : > { %v362_v45 = vadd.f32 %v361_v44, %v359_v43 }
  0x5c   : > { %v363_v46 = vsub.f32 0.0, %v362_v45  ;;  %v374_v60 = vrot.slane %v362_v45, 3 }
  0x5e   : > { %v364_v47 = vmul.f32 1.442695, %v363_v46  ;;  %v375_v0 = vsel %vm288_vm0, %v362_v45, %v374_v60 }
  0x60   : > { %639 = vpow2.f32 %v364_v47 }
  0x66   : > { %v640_v53 = vpop.eup %639 }
  0x67   : > { %v366_v54 = vsub.f32 1.0, %v640_v53 }
  0x69   : > { %v367_v57 = vmul.f32 %v366_v54, %v366_v54 }
  0x6b   : > { %v369_v59 = vrot.slane %v367_v57, 3 }
  0x6d   : > { %v370_v62 = vsel %vm288_vm0, %v367_v57, %v369_v59 }
  0x6e   : > { %v372_v63 = vmul.f32 %v370_v62, %v352_v58 }
  0x70   : > { %v377_v1 = vmul.f32 %v375_v0, %v372_v63 }
  0x72   : > { %382 = vst.msk [vmem:[%s263_s30] sm:$0x3] %vm380_vm5, %v377_v1 }
  0x73   : > { %743 = shalt.err (!%p740_p13)
}
  0x74   : > { %558 = dma.vmem_to_hbm [thread:$0]  (%p908_p9), %s399_s15, 32, %s401_s4, %s384_s29  }
  0x75 PF: > { %s412_s9 = sand.u32 1, %s786_s12   ;;  %p1018_p0 = scmp.ge.s32.totalorder %s806_s17, 2 }
  0x76   : > { %s413_s6 = scalar_lea.sflag [#allocation4], %s412_s9 }
  0x77   : > { %p572_p3 = pnand %p1018_p0, %p879_p6 }
  0x79   : > { %p573_p5 = pneg %p572_p3 }
  0x7b   : > { %781 = dma.done.wait (%p573_p5), %s413_s6, 32  }
  0x7c   : > { %783 = vsyncadd (%p573_p5), %s413_s6, 4294967264  ;;  %s23_s17 = sadd.s32 1, %s806_s17   ;;  %s1019_s22 = sld [smem:[#allocation15_spill]] }
  0x7d   : > { %p20_p7 = scmp.ge.s32.totalorder %s23_s17, 4   ;;  %s1020_s5 = sld [smem:[#allocation14_spill]] }
  0x7e   : > { %s1021_s12 = smov %s790_s13  ;;  %s1022_s13 = smov %s794_s14 }
  0x7f   : > { %s1024_s15 = smov %s802_s16  ;;  %22 = sbr.rel (!%p20_p7) target bundleno = 11 (0xb), region = 98 }
  0x82   : > { %s1023_s14 = smov %s1019_s22 }
  0x83   : > { %s1025_s16 = smov %s1020_s5 }
  0x84   :  { %419 = vsyncpa [#allocation3], 1 }
  0x85   :  { %421 = vsyncpa [#allocation3 + $0x1], 1 }
  0x86   :  { %422 = vsyncpa [#allocation8], 1 }
  0x87   :  { %424 = vsyncpa [#allocation8 + $0x1], 1 }
  0x88   :  { %425 = vsyncpa [#allocation4], 1 }
  0x89   :  { %427 = vsyncpa [#allocation4 + $0x1], 1 }
  0x8a   :  { %428 = vsyncpa [#allocation5], 1 }
  0x8b   :  { %430 = vsyncpa [#allocation5 + $0x1], 1 }

</bundles_post_ra>
